<compile_context>
chip_gen: v6e
topology: v6e:2x2x1
jax: 0.10.0
libtpu: 0.0.40
codegen_flags: <defaults>
</compile_context>

<pallas_src>
import functools

import jax
import jax.numpy as jnp
from jax.experimental import pallas as pl
from jax.experimental.pallas import tpu as pltpu

# -------------------- model dims (PyTorch module) --------------------
D_IN = 32          # example input feature dim
H1, H2, H3 = 20, 10, 5

# -------------------- padded dims used inside the kernel --------------------
HP = 128           # lane-padded hidden width (all hidden matmuls lane-dense)
SUBLANE = 8
MAX_TILE_B = 4096          # max batch tile (sweep 2048..8192 for peak)
MEGACORE_SPLIT_B = 1024    # above this, force >= 2 grid steps (v7x 2 TCs)


def _round_up(n, m):
    return ((n + m - 1) // m) * m


def _mlp_kernel(x_ref, w_ref, b_ref, o_ref, *, d_in):
    """Fused 3-layer MLP on one batch tile (ReLU after each layer, eval dropout)."""
    d_in_pad = _round_up(d_in, SUBLANE)

    x = x_ref[...]                                   # (tile_b, d_in) bf16
    w = w_ref[...]                                   # (d_in_pad + 2*HP, HP) bf16
    b = b_ref[...]                                   # (3, HP) f32, rows = [b1;b2;b3]

    w1 = w[0:d_in, :]                                # (d_in, HP)
    w2 = w[d_in_pad:d_in_pad + HP, :]                # (HP, HP)
    w3 = w[d_in_pad + HP:d_in_pad + 2 * HP, :]       # (HP, HP)

    # Layer 1: bf16 MXU matmul, f32 accumulate, f32 bias + ReLU.
    h = jnp.dot(x, w1, preferred_element_type=jnp.float32)
    h = jnp.maximum(h + b[0:1, :], 0.0)              # dropout1 = identity (eval)

    # Layer 2.
    h = jnp.dot(h.astype(jnp.bfloat16), w2, preferred_element_type=jnp.float32)
    h = jnp.maximum(h + b[1:2, :], 0.0)              # dropout2 = identity (eval)

    # Layer 3.
    h = jnp.dot(h.astype(jnp.bfloat16), w3, preferred_element_type=jnp.float32)
    h = jnp.maximum(h + b[2:3, :], 0.0)              # dropout3 = identity (eval)

    # Only the first H3 lanes are meaningful (padded lanes are exactly zero).
    o_ref[...] = h[:, :H3].astype(o_ref.dtype)


def prepare_params(w1, b1, w2, b2, w3, b3):
    """Zero-pad + pack weights into one bf16 slab; biases into one f32 block.

    Done ONCE, outside the jitted forward path.
    """
    d_in = w1.shape[0]
    d_in_pad = _round_up(d_in, SUBLANE)
    rows = d_in_pad + 2 * HP

    w_slab = jnp.zeros((rows, HP), jnp.float32)
    w_slab = w_slab.at[:d_in, :H1].set(w1)
    w_slab = w_slab.at[d_in_pad:d_in_pad + H1, :H2].set(w2)
    w_slab = w_slab.at[d_in_pad + HP:d_in_pad + HP + H2, :H3].set(w3)
    w_slab = w_slab.astype(jnp.bfloat16)

    b_p = (jnp.zeros((3, HP), jnp.float32)
           .at[0, :H1].set(b1)
           .at[1, :H2].set(b2)
           .at[2, :H3].set(b3))
    return w_slab, b_p


@jax.jit
def mlp_forward(x, w_slab, b_p):
    """x: [B, d_in] float32 -> [B, 5] float32 (eval-mode forward)."""
    B, d_in = x.shape
    d_in_pad = _round_up(d_in, SUBLANE)
    b_pad = _round_up(B, SUBLANE)

    # Tile selection: bound by MAX_TILE_B, force >= 2 roughly-equal tiles when the
    # batch is big enough to feed both v7x TensorCores, avoid a near-empty tail.
    n_tiles = max(pl.cdiv(b_pad, MAX_TILE_B),
                  2 if b_pad > MEGACORE_SPLIT_B else 1)
    tile_b = _round_up(pl.cdiv(b_pad, n_tiles), SUBLANE)
    tile_b = min(tile_b, B)          # B < tile_b => block == full dim (always legal)
    grid = (pl.cdiv(B, tile_b),)

    x_bf = x.astype(jnp.bfloat16)    # halves the streamed HBM read of x

    kernel = functools.partial(_mlp_kernel, d_in=d_in)

    return pl.pallas_call(
        kernel,
        out_shape=jax.ShapeDtypeStruct((B, H3), jnp.float32),
        grid=grid,
        in_specs=[
            pl.BlockSpec((tile_b, d_in), lambda i: (i, 0)),          # x: streamed
            pl.BlockSpec((d_in_pad + 2 * HP, HP), lambda i: (0, 0)),  # weight slab
            pl.BlockSpec((3, HP), lambda i: (0, 0)),                  # biases (f32)
        ],
        out_specs=pl.BlockSpec((tile_b, H3), lambda i: (i, 0)),
        compiler_params=pltpu.CompilerParams(
            dimension_semantics=("parallel",),   # megacore shard on v7x
            vmem_limit_bytes=32 << 20,
        ),
    )(x_bf, w_slab, b_p)


def _torch_linear_init(key, fan_in, fan_out):
    """Deterministic init mimicking torch.nn.Linear default (U(-1/sqrt(fan_in), +))."""
    kw, kb = jax.random.split(key)
    bound = 1.0 / jnp.sqrt(jnp.float32(fan_in))
    w = jax.random.uniform(kw, (fan_in, fan_out), jnp.float32, -bound, bound)
    b = jax.random.uniform(kb, (fan_out,), jnp.float32, -bound, bound)
    return w, b


def reference_forward(x, w1, b1, w2, b2, w3, b3):
    z = jnp.maximum(x @ w1 + b1, 0.0)
    z = jnp.maximum(z @ w2 + b2, 0.0)
    z = jnp.maximum(z @ w3 + b3, 0.0)
    return z


if __name__ == "__main__":
    key = jax.random.PRNGKey(0)
    kx1, kx2, k1, k2, k3 = jax.random.split(key, 5)

    w1, b1 = _torch_linear_init(k1, D_IN, H1)
    w2, b2 = _torch_linear_init(k2, H1, H2)
    w3, b3 = _torch_linear_init(k3, H2, H3)

    # Pad + pack params once (hoisted out of the jitted forward path).
    params = prepare_params(w1, b1, w2, b2, w3, b3)
    params = jax.tree_util.tree_map(jax.block_until_ready, params)

    # bf16 matmul inputs -> loosened tolerances vs. the f32 reference.
    ATOL = RTOL = 3e-2

    # Case 1: small, sublane-aligned batch.
    B = 8
    x = jax.random.normal(kx1, (B, D_IN), jnp.float32)
    out = jax.block_until_ready(mlp_forward(x, *params))
    ref = reference_forward(x, w1, b1, w2, b2, w3, b3)
    assert out.shape == (B, H3), out.shape
    assert jnp.allclose(out, ref, atol=ATOL, rtol=RTOL), (
        float(jnp.max(jnp.abs(out - ref))))

    # Case 2: batch not a multiple of 8 (exercises full-dim block fallback).
    B2 = 37
    x2 = jax.random.normal(kx2, (B2, D_IN), jnp.float32)
    out2 = jax.block_until_ready(mlp_forward(x2, *params))
    ref2 = reference_forward(x2, w1, b1, w2, b2, w3, b3)
    assert out2.shape == (B2, H3), out2.shape
    assert jnp.allclose(out2, ref2, atol=ATOL, rtol=RTOL), (
        float(jnp.max(jnp.abs(out2 - ref2))))

    print("KERNEL_OK")
</pallas_src>

<mosaic_0001>
module attributes {stable_mosaic.version = 11 : i64} {
  func.func @_mlp_kernel(%arg0: i32, %arg1: memref<8x32xbf16, #tpu.memory_space<vmem>>, %arg2: memref<288x128xbf16, #tpu.memory_space<vmem>>, %arg3: memref<3x128xf32, #tpu.memory_space<vmem>>, %arg4: memref<8x5xf32, #tpu.memory_space<vmem>>) attributes {dimension_semantics = [#tpu.dimension_semantics<parallel>], iteration_bounds = array<i64: 1>, scalar_prefetch = 0 : i64, scratch_operands = 0 : i64, tpu.core_type = #tpu.core_type<tc>, window_params = [{transform_indices = @transform_0, window_bounds = array<i64: 8, 32>}, {pipeline_mode = #tpu.pipeline_mode<synchronous>, transform_indices = @transform_1, window_bounds = array<i64: 288, 128>}, {pipeline_mode = #tpu.pipeline_mode<synchronous>, transform_indices = @transform_2, window_bounds = array<i64: 3, 128>}, {transform_indices = @transform_3, window_bounds = array<i64: 8, 5>}]} {
    %c0 = arith.constant 0 : index
    %c0_0 = arith.constant 0 : index
    %0 = vector.load %arg1[%c0, %c0_0] : memref<8x32xbf16, #tpu.memory_space<vmem>>, vector<8x32xbf16>
    %c0_1 = arith.constant 0 : index
    %c0_2 = arith.constant 0 : index
    %1 = vector.load %arg2[%c0_1, %c0_2] : memref<288x128xbf16, #tpu.memory_space<vmem>>, vector<288x128xbf16>
    %c0_3 = arith.constant 0 : index
    %c0_4 = arith.constant 0 : index
    %2 = vector.load %arg3[%c0_3, %c0_4] : memref<3x128xf32, #tpu.memory_space<vmem>>, vector<3x128xf32>
    %3 = vector.extract_strided_slice %1 {offsets = [0, 0], sizes = [32, 128], strides = [1, 1]} : vector<288x128xbf16> to vector<32x128xbf16>
    %4 = vector.extract_strided_slice %1 {offsets = [32, 0], sizes = [128, 128], strides = [1, 1]} : vector<288x128xbf16> to vector<128x128xbf16>
    %5 = vector.extract_strided_slice %1 {offsets = [160, 0], sizes = [128, 128], strides = [1, 1]} : vector<288x128xbf16> to vector<128x128xbf16>
    %cst = arith.constant dense<0.000000e+00> : vector<8x128xf32>
    %6 = tpu.matmul %0, %3, %cst {dimension_numbers = #tpu.dot_dimension_numbers<[1], [0], [0], [1], [0, 0, 1, 1], [], []>} : vector<8x32xbf16>, vector<32x128xbf16>, vector<8x128xf32> -> vector<8x128xf32>
    %7 = vector.extract_strided_slice %2 {offsets = [0, 0], sizes = [1, 128], strides = [1, 1]} : vector<3x128xf32> to vector<1x128xf32>
    %8 = vector.broadcast %7 : vector<1x128xf32> to vector<8x128xf32>
    %9 = arith.addf %6, %8 : vector<8x128xf32>
    %cst_5 = arith.constant 0.000000e+00 : f32
    %10 = vector.broadcast %cst_5 : f32 to vector<8x128xf32>
    %11 = arith.maximumf %9, %10 : vector<8x128xf32>
    %12 = arith.truncf %11 : vector<8x128xf32> to vector<8x128xbf16>
    %cst_6 = arith.constant dense<0.000000e+00> : vector<8x128xf32>
    %13 = tpu.matmul %12, %4, %cst_6 {dimension_numbers = #tpu.dot_dimension_numbers<[1], [0], [0], [1], [0, 0, 1, 1], [], []>} : vector<8x128xbf16>, vector<128x128xbf16>, vector<8x128xf32> -> vector<8x128xf32>
    %14 = vector.extract_strided_slice %2 {offsets = [1, 0], sizes = [1, 128], strides = [1, 1]} : vector<3x128xf32> to vector<1x128xf32>
    %15 = vector.broadcast %14 : vector<1x128xf32> to vector<8x128xf32>
    %16 = arith.addf %13, %15 : vector<8x128xf32>
    %cst_7 = arith.constant 0.000000e+00 : f32
    %17 = vector.broadcast %cst_7 : f32 to vector<8x128xf32>
    %18 = arith.maximumf %16, %17 : vector<8x128xf32>
    %19 = arith.truncf %18 : vector<8x128xf32> to vector<8x128xbf16>
    %cst_8 = arith.constant dense<0.000000e+00> : vector<8x128xf32>
    %20 = tpu.matmul %19, %5, %cst_8 {dimension_numbers = #tpu.dot_dimension_numbers<[1], [0], [0], [1], [0, 0, 1, 1], [], []>} : vector<8x128xbf16>, vector<128x128xbf16>, vector<8x128xf32> -> vector<8x128xf32>
    %21 = vector.extract_strided_slice %2 {offsets = [2, 0], sizes = [1, 128], strides = [1, 1]} : vector<3x128xf32> to vector<1x128xf32>
    %22 = vector.broadcast %21 : vector<1x128xf32> to vector<8x128xf32>
    %23 = arith.addf %20, %22 : vector<8x128xf32>
    %cst_9 = arith.constant 0.000000e+00 : f32
    %24 = vector.broadcast %cst_9 : f32 to vector<8x128xf32>
    %25 = arith.maximumf %23, %24 : vector<8x128xf32>
    %26 = vector.extract_strided_slice %25 {offsets = [0, 0], sizes = [8, 5], strides = [1, 1]} : vector<8x128xf32> to vector<8x5xf32>
    %c0_10 = arith.constant 0 : index
    %c0_11 = arith.constant 0 : index
    %27 = vector.load %arg4[%c0_10, %c0_11] : memref<8x5xf32, #tpu.memory_space<vmem>>, vector<8x5xf32>
    tpu.vector_store %arg4[%c0_10, %c0_11], %26 {strides = array<i32>} : memref<8x5xf32, #tpu.memory_space<vmem>>, vector<8x5xf32>,
    return
  }
  func.func @transform_0(%arg0: i32) -> (i32, i32) {
    %c0_i32 = arith.constant 0 : i32
    %c0_i32_0 = arith.constant 0 : i32
    return %arg0, %c0_i32 : i32, i32
  }
  func.func @transform_1(%arg0: i32) -> (i32, i32) {
    %c0_i32 = arith.constant 0 : i32
    %c0_i32_0 = arith.constant 0 : i32
    %c0_i32_1 = arith.constant 0 : i32
    return %c0_i32, %c0_i32_0 : i32, i32
  }
  func.func @transform_2(%arg0: i32) -> (i32, i32) {
    %c0_i32 = arith.constant 0 : i32
    %c0_i32_0 = arith.constant 0 : i32
    %c0_i32_1 = arith.constant 0 : i32
    return %c0_i32, %c0_i32_0 : i32, i32
  }
  func.func @transform_3(%arg0: i32) -> (i32, i32) {
    %c0_i32 = arith.constant 0 : i32
    %c0_i32_0 = arith.constant 0 : i32
    return %arg0, %c0_i32 : i32, i32
  }
}

</mosaic_0001>

<bundles_post_ra>
// kernel: mlp_forward.1
= control target key start
LH: loop header
LB: loop body
LE: loop exit
PB: predicated region body
PF: predicated region fallthrough
CT: control target
= control target key end

     0   :  { %8 = vsyncpa [#allocation3], 0  ;;  %s552_s0 = inlined_call_operand.vmem [shape: bf16[8,32], index: 0, kind: input, shape index: {}]   ;;  %s553_s1 = inlined_call_operand.hbm [shape: bf16[288,128], index: 1, kind: input, shape index: {}]   ;;  %s554_s2 = inlined_call_operand.vmem [shape: f32[3,128], index: 2, kind: input, shape index: {}]   ;;  %s555_s3 = inlined_call_operand.hbm [shape: f32[8,5], index: 3, kind: output, shape index: {}]  }
   0x1   :  { %9 = vsyncpa [#allocation4], 0  ;;  %s490_s12 = smov [#allocation2]  }
   0x2   :  { %s17_s13 = sshll.u32 %s490_s12, 4  ;;  %s18_s13 = int_to_ptr.vmem [resolvable:$true] %s17_s13 }
   0x3   :  { %s454_s14 = scalar_lea.vmem %s18_s13, 2304  ;;  %p459_p1 = scmp.lt.s32.totalorder %s18_s13, %s18_s13 }
   0x4   :  { %p455_p0 = scmp.ne.s32.totalorder %s18_s13, %s454_s14  ;;  %p460_p2 = scmp.lt.s32.totalorder %s454_s14, %s454_s14 }
   0x6   :  { %p461_p3 = por %p460_p2, %p459_p1 }
   0x8   :  { %p462_p4 = pnand %p461_p3, %p455_p0 }
   0xa   :  { %465 = shalt.err (!%p462_p4)
}
   0xb   :  { %s491_s15 = smov 64   ;;  %s492_s16 = smov 4  }
   0xc   :  { %23 = dma.hbm_to_vmem [thread:$0]  %s553_s1, 2304, %s18_s13, [#allocation3], %s491_s15, %s491_s15, %s492_s16  }
   0xd   :  { %486 = dma.done.wait [#allocation3], 2304  }
   0xe   :  { %487 = vsyncadd [#allocation3], 4294964992  ;;  %v493_v0 = vmov 0.0   ;;  %vm494_vm0 = vmmov 0   ;;  %v428_v1 = vld [vmem:[#allocation2 + $0x8] sm:$0xff]   ;;  %v429_v2 = vld [vmem:[#allocation2] sm:$0xff]   ;;  %v68_v18 = vlaneseq }
   0xf   :  { %374 = vmatprep.subr.bf16.mxu0 %v493_v0  ;;  %378 = vmatprep.mubr.msk.bf16.mxu0 %vm494_vm0, %v493_v0  ;;  %v430_v3 = vld [vmem:[#allocation2 + $0x48] sm:$0xff]   ;;  %vm84_vm1 = vcmask 261120   ;;  %v431_v4 = vld [vmem:[#allocation2 + $0x40] sm:$0xff]   ;;  %v432_v6 = vld [vmem:[#allocation2 + $0x38] sm:$0xff]   ;;  %vm317_vm2 = vcmask 39936  }
  0x10   :  { %382 = vmatprep.subr.bf16.mxu1 %v493_v0  ;;  %398 = vmatprep.mubr.msk.bf16.mxu1 %vm494_vm0, %v493_v0  ;;  %v30_v5 = vld [vmem:[%s552_s0] sm:$0xf]  ;;  %v433_v7 = vld [vmem:[#allocation2 + $0x30] sm:$0xff]   ;;  %v434_v8 = vld [vmem:[#allocation2 + $0x28] sm:$0xff]   ;;  %v69_v19 = vshrl.u32 %v68_v18, 7 }
  0x11   :  { %375 = vmatpush3.bf16.msra.mxu0 %v428_v1  ;;  %383 = vmatpush3.bf16.msra.mxu1 %v430_v3  ;;  %v435_v9 = vld [vmem:[#allocation2 + $0x20] sm:$0xff]   ;;  %v436_v10 = vld [vmem:[#allocation2 + $0x18] sm:$0xff]   ;;  %v437_v11 = vld [vmem:[#allocation2 + $0x10] sm:$0xff]  }
  0x12   :  { %376 = vmatprep.subr.bf16.mxu0 %v493_v0  ;;  %384 = vmatprep.subr.bf16.mxu1 %v493_v0  ;;  %v438_v12 = vld [vmem:[#allocation2 + $0x88] sm:$0xff]   ;;  %v439_v13 = vld [vmem:[#allocation2 + $0x80] sm:$0xff]   ;;  %v440_v14 = vld [vmem:[#allocation2 + $0x78] sm:$0xff]   ;;  %v70_v20 = vsub.s32 0, %v69_v19  ;;  %v132_v32 = vsub.s32 1, %v69_v19  ;;  %v226_v41 = vsub.s32 2, %v69_v19 }
  0x13   :  { %v441_v15 = vld [vmem:[#allocation2 + $0x70] sm:$0xff]   ;;  %v442_v16 = vld [vmem:[#allocation2 + $0x68] sm:$0xff]   ;;  %v443_v17 = vld [vmem:[#allocation2 + $0x60] sm:$0xff]  }
  0x14   :  { %v67_v21 = vld [vmem:[%s554_s2] sm:$0x7]  ;;  %v444_v30 = vld [vmem:[#allocation2 + $0x58] sm:$0xff]   ;;  %v445_v31 = vld [vmem:[#allocation2 + $0x50] sm:$0xff]   ;;  %s495_s2 = smov [#allocation5]  }
  0x15   :  { %377 = vmatpush3.bf16.msra.mxu0 %v429_v2  ;;  %385 = vmatpush3.bf16.msra.mxu1 %v431_v4  ;;  %v71_v22 = vrot.slane %v67_v21, %v70_v20  ;;  %v133_v33 = vrot.slane %v67_v21, %v132_v32  ;;  %v227_v42 = vrot.slane %v67_v21, %v226_v41  ;;  %s325_s21 = sshll.u32 %s495_s2, 4  ;;  %s326_s21 = int_to_ptr.vmem [resolvable:$true] %s325_s21 }
  0x16   :  { %402 = vmatprep.subr.bf16.mxu0 %v493_v0  ;;  %386 = vmatprep.subr.bf16.mxu1 %v493_v0  ;;  %s466_s22 = scalar_lea.vmem %s326_s21, 128  ;;  %p471_p6 = scmp.lt.s32.totalorder %s326_s21, %s326_s21 }
  0x17   :  { %p467_p5 = scmp.ne.s32.totalorder %s326_s21, %s466_s22  ;;  %p472_p7 = scmp.lt.s32.totalorder %s466_s22, %s466_s22 }
  0x18   :  { %379 = vmatmul.mubr.msk.bf16.vlgmr.msra.gmra.mxu0 %vm84_vm1, %v30_v5 }
  0x19   :  { %418 = vmatprep.mubr.msk.bf16.mxu0 %vm494_vm0, %v493_v0  ;;  %387 = vmatpush3.bf16.msra.mxu1 %v432_v6  ;;  %p473_p8 = por %p472_p7, %p471_p6 }
  0x1a   :  { %388 = vmatprep.subr.bf16.mxu1 %v493_v0  ;;  %403 = vmatpush3.bf16.msra.mxu0 %v438_v12 }
  0x1b   :  { %404 = vmatprep.subr.bf16.mxu0 %v493_v0  ;;  %p474_p9 = pnand %p473_p8, %p467_p5 }
  0x1d   :  { %389 = vmatpush3.bf16.msra.mxu1 %v433_v7 }
  0x1e   :  { %390 = vmatprep.subr.bf16.mxu1 %v493_v0  ;;  %405 = vmatpush3.bf16.msra.mxu0 %v439_v13 }
  0x1f   :  { %406 = vmatprep.subr.bf16.mxu0 %v493_v0 }
  0x21   :  { %391 = vmatpush3.bf16.msra.mxu1 %v434_v8 }
  0x22   :  { %392 = vmatprep.subr.bf16.mxu1 %v493_v0  ;;  %407 = vmatpush3.bf16.msra.mxu0 %v440_v14 }
  0x23   :  { %408 = vmatprep.subr.bf16.mxu0 %v493_v0 }
  0x25   :  { %393 = vmatpush3.bf16.msra.mxu1 %v435_v9 }
  0x26   :  { %394 = vmatprep.subr.bf16.mxu1 %v493_v0  ;;  %409 = vmatpush3.bf16.msra.mxu0 %v441_v15 }
  0x27   :  { %410 = vmatprep.subr.bf16.mxu0 %v493_v0 }
  0x29   :  { %395 = vmatpush3.bf16.msra.mxu1 %v436_v10 }
  0x2a   :  { %396 = vmatprep.subr.bf16.mxu1 %v493_v0  ;;  %411 = vmatpush3.bf16.msra.mxu0 %v442_v16 }
  0x2b   :  { %412 = vmatprep.subr.bf16.mxu0 %v493_v0 }
  0x2d   :  { %397 = vmatpush3.bf16.msra.mxu1 %v437_v11 }
  0x2e   :  { %413 = vmatpush3.bf16.msra.mxu0 %v443_v17 }
  0x2f   :  { %414 = vmatprep.subr.bf16.mxu0 %v493_v0 }
  0x32   :  { %415 = vmatpush3.bf16.msra.mxu0 %v444_v30 }
  0x33   :  { %416 = vmatprep.subr.bf16.mxu0 %v493_v0 }
  0x36   :  { %417 = vmatpush3.bf16.msra.mxu0 %v445_v31 }
  0xd8   :  { %v122_v23 = vpop.f32.mrf.mxu0 }
  0xd9   :  { %v123_v24 = vadd.f32 %v122_v23, %v71_v22 }
  0xda   :  { %v380_v25 = vpop.f32.mrf.mxu0 }
  0xdb   :  { %v128_v26 = vmax.f32 %v123_v24, 0.0 }
  0xdc   :  { %v125_v27 = vpop.f32.mrf.mxu0 }
  0xdd   :  { %v129_v28 = vpack.c.bf16 %v128_v26, %v128_v26 }
  0xde   :  { %v381_v29 = vpop.f32.mrf.mxu0 }
  0xdf   :  { %399 = vmatmul.mubr.bf16.vlgmr.msra.gmra.mxu1 %v129_v28 }
 0x19f   :  { %v216_v34 = vpop.f32.mrf.mxu1 }
 0x1a0   :  { %v217_v35 = vadd.f32 %v216_v34, %v133_v33 }
 0x1a1   :  { %v400_v36 = vpop.f32.mrf.mxu1 }
 0x1a2   :  { %v222_v37 = vmax.f32 %v217_v35, 0.0 }
 0x1a3   :  { %v219_v38 = vpop.f32.mrf.mxu1 }
 0x1a4   :  { %v223_v39 = vpack.c.bf16 %v222_v37, %v222_v37 }
 0x1a5   :  { %v401_v40 = vpop.f32.mrf.mxu1 }
 0x1a6   :  { %419 = vmatmul.mubr.bf16.vlgmr.msra.gmra.mxu0 %v223_v39 }
 0x266   :  { %v310_v43 = vpop.f32.mrf.mxu0 }
 0x267   :  { %v311_v44 = vadd.f32 %v310_v43, %v227_v42 }
 0x268   :  { %v420_v45 = vpop.f32.mrf.mxu0 }
 0x269   :  { %v316_v46 = vmax.f32 %v311_v44, 0.0 }
 0x26a   :  { %v313_v47 = vpop.f32.mrf.mxu0 }
 0x26b   :  { %318 = vst.msk [vmem:[#allocation5] sm:$0xff] %vm317_vm2, %v316_v46 }
 0x26c   :  { %v421_v48 = vpop.f32.mrf.mxu0 }
 0x26d   :  { %477 = shalt.err (!%p474_p9)
}
 0x26e   :  { %328 = dma.vmem_to_hbm [thread:$0]  %s326_s21, 128, %s555_s3, [#allocation4]  }
 0x26f   :  { %488 = dma.done.wait [#allocation4], 128  }
 0x270   :  { %489 = vsyncadd [#allocation4], 4294967168 }
 0x271   :  { %332 = vsyncpa [#allocation3], 1 }
 0x272   :  { %333 = vsyncpa [#allocation4], 1 }

</bundles_post_ra>
